<compile_context>
chip_gen: v6e
topology: v6e:2x2x1
jax: 0.10.0
libtpu: 0.0.40
codegen_flags: <defaults>
</compile_context>

<pallas_src>
import numpy as np
import jax
import jax.numpy as jnp
from jax.experimental import pallas as pl
from jax.experimental.pallas import tpu as pltpu

LANE = 128


# ---------------------------------------------------------------------------
# Host-side construction of the linear spatial operators (deterministic).
# ---------------------------------------------------------------------------
def adaptive_avg_pool_matrix(out_size: int, in_size: int) -> np.ndarray:
    """P[o, i] such that (P @ v) == adaptive_avg_pool1d(v, out_size)."""
    P = np.zeros((out_size, in_size), np.float32)
    for o in range(out_size):
        start = (o * in_size) // out_size
        end = -((-(o + 1) * in_size) // out_size)  # ceil((o+1)*in/out)
        P[o, start:end] = 1.0 / float(end - start)
    return P


def bilinear_upsample_matrix(out_size: int, in_size: int) -> np.ndarray:
    """U[o, i] for 1-D linear interpolation with align_corners=True."""
    U = np.zeros((out_size, in_size), np.float32)
    if in_size == 1:
        U[:, 0] = 1.0
        return U
    for o in range(out_size):
        src = o * (in_size - 1) / (out_size - 1) if out_size > 1 else 0.0
        i0 = min(int(np.floor(src)), in_size - 1)
        i1 = min(i0 + 1, in_size - 1)
        w1 = src - i0
        U[o, i0] += 1.0 - w1
        U[o, i1] += w1
    return U


def build_packed_spatial_ops(bins, H, W):
    """All-branch pooling / upsample operators packed on one padded PQ axis.

    Returns:
      mt:  (HW, PQ_pad)  -> pooled_all = x(C,HW) @ mt
      ut:  (PQ_pad, HW)  -> up_all     = z(nB*R,PQ_pad) @ ut
      offs, pqs, pq_pad
    """
    HW = H * W
    pqs = [b * b for b in bins]
    sum_pq = sum(pqs)
    pq_pad = max(LANE, ((sum_pq + LANE - 1) // LANE) * LANE)
    mt = np.zeros((HW, pq_pad), np.float32)
    ut = np.zeros((pq_pad, HW), np.float32)
    offs = []
    off = 0
    for b, pq in zip(bins, pqs):
        Ph = adaptive_avg_pool_matrix(b, H)
        Pw = adaptive_avg_pool_matrix(b, W)
        Uh = bilinear_upsample_matrix(H, b)
        Uw = bilinear_upsample_matrix(W, b)
        M = np.kron(Ph, Pw)          # (pq, HW), spatial flattened row-major
        U = np.kron(Uh, Uw)          # (HW, pq)
        mt[:, off:off + pq] = M.T
        ut[off:off + pq, :] = U.T
        offs.append(off)
        off += pq
    return jnp.asarray(mt), jnp.asarray(ut), offs, pqs, pq_pad


def build_branch_mask(n_branches, R, offs, pqs, pq_pad):
    """Row-block b of the mask selects only branch b's PQ columns."""
    mask = np.zeros((n_branches * R, pq_pad), np.float32)
    for b, (off, pq) in enumerate(zip(offs, pqs)):
        mask[b * R:(b + 1) * R, off:off + pq] = 1.0
    return jnp.asarray(mask)


# ---------------------------------------------------------------------------
# Fused Pallas kernel: all branches + identity concat, one batch element per
# grid step.  Layout: channels on sublane, spatial (HW) on lane.
# ---------------------------------------------------------------------------
def make_ppm_kernel(C: int, n_out: int):
    def kernel(x_ref, w_ref, bias_ref, mt_ref, mask_ref, ut_ref, o_ref):
        x = x_ref[0]                                             # (C, HW)

        # Identity branch of the concat: copy x straight into the output.
        o_ref[0, 0:C, :] = x.astype(o_ref.dtype)

        # Adaptive average pool of ALL branches: one MXU matmul, contraction
        # over the lane-dense HW axis.
        pooled = jnp.dot(x, mt_ref[...],
                         preferred_element_type=jnp.float32)    # (C, PQ_pad)

        # Stacked 1x1 conv (BN scale pre-folded into weights) + BN bias + ReLU
        # on the tiny pooled tensor.  Columns belonging to other branches /
        # padding are zeroed by the mask so they cannot contaminate the
        # upsample matmul below.
        y = jnp.dot(w_ref[...], pooled,
                    preferred_element_type=jnp.float32)         # (nB*R, PQ_pad)
        z = jnp.maximum(y + bias_ref[...], 0.0) * mask_ref[...]

        # Bilinear upsample (align_corners=True) of all branches at once:
        # one MXU matmul, one lane-dense store of the whole pyramid block.
        up = jnp.dot(z, ut_ref[...],
                     preferred_element_type=jnp.float32)        # (nB*R, HW)
        o_ref[0, C:C + n_out, :] = up.astype(o_ref.dtype)

    return kernel


def pyramid_pooling_module(x_nchw, w_all, bias_all, mt, mask, ut):
    """x_nchw: (N, C, H, W) -> (N, C + n_branches*R, H, W)  (torch.cat order)."""
    N, C, H, W = x_nchw.shape
    HW = H * W
    n_out = w_all.shape[0]                 # n_branches * reduction_dim
    C_out = C + n_out

    # NCHW-flat: pure reshape (no transpose); spatial stays on the lane dim.
    x_flat = x_nchw.reshape(N, C, HW)

    kernel = make_ppm_kernel(C, n_out)
    out_flat = pl.pallas_call(
        kernel,
        out_shape=jax.ShapeDtypeStruct((N, C_out, HW), x_nchw.dtype),
        grid=(N,),
        in_specs=[
            pl.BlockSpec((1, C, HW), lambda n: (n, 0, 0)),
            pl.BlockSpec(w_all.shape, lambda n: (0, 0)),
            pl.BlockSpec(bias_all.shape, lambda n: (0, 0)),
            pl.BlockSpec(mt.shape, lambda n: (0, 0)),
            pl.BlockSpec(mask.shape, lambda n: (0, 0)),
            pl.BlockSpec(ut.shape, lambda n: (0, 0)),
        ],
        out_specs=pl.BlockSpec((1, C_out, HW), lambda n: (n, 0, 0)),
        compiler_params=pltpu.CompilerParams(
            dimension_semantics=("parallel",)),   # batch shards across TCs on v7x
    )(x_flat, w_all, bias_all, mt, mask, ut)

    return out_flat.reshape(N, C_out, H, W)


# ---------------------------------------------------------------------------
# Host-side parameter prep (eval-mode BN folded into the 1x1 conv).
# ---------------------------------------------------------------------------
def init_params(key, in_dim, reduction_dim, bins, eps=1e-5):
    params = []
    for _ in bins:
        key, k1, k2, k3, k4, k5 = jax.random.split(key, 6)
        w = jax.random.normal(k1, (reduction_dim, in_dim), jnp.float32) * 0.1
        gamma = jax.random.uniform(k2, (reduction_dim,), jnp.float32, 0.5, 1.5)
        beta = jax.random.normal(k3, (reduction_dim,), jnp.float32) * 0.1
        r_mean = jax.random.normal(k4, (reduction_dim,), jnp.float32) * 0.1
        r_var = jax.random.uniform(k5, (reduction_dim,), jnp.float32, 0.5, 1.5)
        scale = gamma / jnp.sqrt(r_var + eps)          # eval-mode folded BN
        bias = beta - r_mean * scale
        params.append({"w": w, "scale": scale, "bias": bias})
    return params


def stack_branch_params(branch_params):
    """Fold BN scale into conv weights and stack all branches."""
    w_fold = [p["scale"][:, None] * p["w"] for p in branch_params]   # (R, C)
    w_all = jnp.concatenate(w_fold, axis=0)                          # (nB*R, C)
    bias_all = jnp.concatenate(
        [p["bias"][:, None] for p in branch_params], axis=0)         # (nB*R, 1)
    return w_all, bias_all


# Pure-JAX reference in the ORIGINAL per-branch op order (pool -> conv -> BN
# -> ReLU -> upsample) to validate the fused / packed kernel.
def reference(x_nchw, branch_params, bins):
    N, C, H, W = x_nchw.shape
    xf = x_nchw.reshape(N, C, H * W)
    outs = [x_nchw]
    for b, p in zip(bins, branch_params):
        Ph = adaptive_avg_pool_matrix(b, H)
        Pw = adaptive_avg_pool_matrix(b, W)
        Uh = bilinear_upsample_matrix(H, b)
        Uw = bilinear_upsample_matrix(W, b)
        M = jnp.asarray(np.kron(Ph, Pw))   # (pq, HW)
        U = jnp.asarray(np.kron(Uh, Uw))   # (HW, pq)
        pooled = jnp.einsum("qh,nch->ncq", M, xf)
        conv = jnp.einsum("rc,ncq->nrq", p["w"], pooled)
        z = jnp.maximum(conv * p["scale"][None, :, None]
                        + p["bias"][None, :, None], 0.0)
        up = jnp.einsum("hq,nrq->nrh", U, z)
        outs.append(up.reshape(N, -1, H, W))
    return jnp.concatenate(outs, axis=1)


if __name__ == "__main__":
    # Small shapes: N=2, in_dim=8, H=W=16, bins=(1,2,3,6), reduction_dim=2.
    N, in_dim, H, W = 2, 8, 16, 16
    bins = (1, 2, 3, 6)
    reduction_dim = 2

    key = jax.random.PRNGKey(0)
    key, kx = jax.random.split(key)
    x = jax.random.normal(kx, (N, in_dim, H, W), jnp.float32)

    branch_params = init_params(key, in_dim, reduction_dim, bins)
    w_all, bias_all = stack_branch_params(branch_params)
    mt, ut, offs, pqs, pq_pad = build_packed_spatial_ops(bins, H, W)
    mask = build_branch_mask(len(bins), reduction_dim, offs, pqs, pq_pad)

    out = pyramid_pooling_module(x, w_all, bias_all, mt, mask, ut)
    out = jax.block_until_ready(out)

    expected_channels = in_dim + reduction_dim * len(bins)
    assert out.shape == (N, expected_channels, H, W), out.shape

    ref = jax.block_until_ready(reference(x, branch_params, bins))
    assert jnp.allclose(out, ref, rtol=1e-4, atol=1e-4), "mismatch vs reference"

    print("KERNEL_OK")
</pallas_src>

<mosaic_0001>
module attributes {stable_mosaic.version = 11 : i64} {
  func.func @kernel(%arg0: i32, %arg1: memref<1x8x256xf32, #tpu.memory_space<vmem>>, %arg2: memref<8x8xf32, #tpu.memory_space<vmem>>, %arg3: memref<8x1xf32, #tpu.memory_space<vmem>>, %arg4: memref<256x128xf32, #tpu.memory_space<vmem>>, %arg5: memref<8x128xf32, #tpu.memory_space<vmem>>, %arg6: memref<128x256xf32, #tpu.memory_space<vmem>>, %arg7: memref<1x16x256xf32, #tpu.memory_space<vmem>>) attributes {dimension_semantics = [#tpu.dimension_semantics<parallel>], iteration_bounds = array<i64: 2>, scalar_prefetch = 0 : i64, scratch_operands = 0 : i64, tpu.core_type = #tpu.core_type<tc>, window_params = [{transform_indices = @transform_0, window_bounds = array<i64: 1, 8, 256>}, {pipeline_mode = #tpu.pipeline_mode<synchronous>, transform_indices = @transform_1, window_bounds = array<i64: 8, 8>}, {pipeline_mode = #tpu.pipeline_mode<synchronous>, transform_indices = @transform_2, window_bounds = array<i64: 8, 1>}, {pipeline_mode = #tpu.pipeline_mode<synchronous>, transform_indices = @transform_3, window_bounds = array<i64: 256, 128>}, {pipeline_mode = #tpu.pipeline_mode<synchronous>, transform_indices = @transform_4, window_bounds = array<i64: 8, 128>}, {pipeline_mode = #tpu.pipeline_mode<synchronous>, transform_indices = @transform_5, window_bounds = array<i64: 128, 256>}, {transform_indices = @transform_6, window_bounds = array<i64: 1, 16, 256>}]} {
    %c0 = arith.constant 0 : index
    %c0_0 = arith.constant 0 : index
    %c0_1 = arith.constant 0 : index
    %0 = vector.load %arg1[%c0, %c0_0, %c0_1] : memref<1x8x256xf32, #tpu.memory_space<vmem>>, vector<1x8x256xf32>
    %1 = vector.shape_cast %0 : vector<1x8x256xf32> to vector<8x256xf32>
    %c0_2 = arith.constant 0 : index
    %c0_3 = arith.constant 0 : index
    %c0_4 = arith.constant 0 : index
    %2 = vector.load %arg7[%c0_2, %c0_3, %c0_4] : memref<1x16x256xf32, #tpu.memory_space<vmem>>, vector<1x8x256xf32>
    %3 = vector.shape_cast %2 : vector<1x8x256xf32> to vector<8x256xf32>
    %4 = vector.shape_cast %1 : vector<8x256xf32> to vector<1x8x256xf32>
    tpu.vector_store %arg7[%c0_2, %c0_3, %c0_4], %4 {strides = array<i32>} : memref<1x16x256xf32, #tpu.memory_space<vmem>>, vector<1x8x256xf32>,
    %c0_5 = arith.constant 0 : index
    %c0_6 = arith.constant 0 : index
    %5 = vector.load %arg4[%c0_5, %c0_6] : memref<256x128xf32, #tpu.memory_space<vmem>>, vector<256x128xf32>
    %cst = arith.constant dense<0.000000e+00> : vector<8x128xf32>
    %6 = tpu.matmul %1, %5, %cst {dimension_numbers = #tpu.dot_dimension_numbers<[1], [0], [0], [1], [0, 0, 1, 1], [], []>} : vector<8x256xf32>, vector<256x128xf32>, vector<8x128xf32> -> vector<8x128xf32>
    %c0_7 = arith.constant 0 : index
    %c0_8 = arith.constant 0 : index
    %7 = vector.load %arg2[%c0_7, %c0_8] : memref<8x8xf32, #tpu.memory_space<vmem>>, vector<8x8xf32>
    %cst_9 = arith.constant dense<0.000000e+00> : vector<8x128xf32>
    %8 = tpu.matmul %7, %6, %cst_9 {dimension_numbers = #tpu.dot_dimension_numbers<[1], [0], [0], [1], [0, 0, 1, 1], [], []>} : vector<8x8xf32>, vector<8x128xf32>, vector<8x128xf32> -> vector<8x128xf32>
    %c0_10 = arith.constant 0 : index
    %c0_11 = arith.constant 0 : index
    %9 = vector.load %arg3[%c0_10, %c0_11] : memref<8x1xf32, #tpu.memory_space<vmem>>, vector<8x1xf32>
    %10 = vector.broadcast %9 : vector<8x1xf32> to vector<8x128xf32>
    %11 = arith.addf %8, %10 : vector<8x128xf32>
    %cst_12 = arith.constant 0.000000e+00 : f32
    %12 = vector.broadcast %cst_12 : f32 to vector<8x128xf32>
    %13 = arith.maximumf %11, %12 : vector<8x128xf32>
    %c0_13 = arith.constant 0 : index
    %c0_14 = arith.constant 0 : index
    %14 = vector.load %arg5[%c0_13, %c0_14] : memref<8x128xf32, #tpu.memory_space<vmem>>, vector<8x128xf32>
    %15 = arith.mulf %13, %14 : vector<8x128xf32>
    %c0_15 = arith.constant 0 : index
    %c0_16 = arith.constant 0 : index
    %16 = vector.load %arg6[%c0_15, %c0_16] : memref<128x256xf32, #tpu.memory_space<vmem>>, vector<128x256xf32>
    %cst_17 = arith.constant dense<0.000000e+00> : vector<8x256xf32>
    %17 = tpu.matmul %15, %16, %cst_17 {dimension_numbers = #tpu.dot_dimension_numbers<[1], [0], [0], [1], [0, 0, 1, 1], [], []>} : vector<8x128xf32>, vector<128x256xf32>, vector<8x256xf32> -> vector<8x256xf32>
    %c0_18 = arith.constant 0 : index
    %c8 = arith.constant 8 : index
    %c0_19 = arith.constant 0 : index
    %18 = vector.load %arg7[%c0_18, %c8, %c0_19] : memref<1x16x256xf32, #tpu.memory_space<vmem>>, vector<1x8x256xf32>
    %19 = vector.shape_cast %18 : vector<1x8x256xf32> to vector<8x256xf32>
    %20 = vector.shape_cast %17 : vector<8x256xf32> to vector<1x8x256xf32>
    tpu.vector_store %arg7[%c0_18, %c8, %c0_19], %20 {strides = array<i32>} : memref<1x16x256xf32, #tpu.memory_space<vmem>>, vector<1x8x256xf32>,
    return
  }
  func.func @transform_0(%arg0: i32) -> (i32, i32, i32) {
    %c0_i32 = arith.constant 0 : i32
    %c0_i32_0 = arith.constant 0 : i32
    %c0_i32_1 = arith.constant 0 : i32
    return %arg0, %c0_i32, %c0_i32_0 : i32, i32, i32
  }
  func.func @transform_1(%arg0: i32) -> (i32, i32) {
    %c0_i32 = arith.constant 0 : i32
    %c0_i32_0 = arith.constant 0 : i32
    %c0_i32_1 = arith.constant 0 : i32
    return %c0_i32, %c0_i32_0 : i32, i32
  }
  func.func @transform_2(%arg0: i32) -> (i32, i32) {
    %c0_i32 = arith.constant 0 : i32
    %c0_i32_0 = arith.constant 0 : i32
    %c0_i32_1 = arith.constant 0 : i32
    return %c0_i32, %c0_i32_0 : i32, i32
  }
  func.func @transform_3(%arg0: i32) -> (i32, i32) {
    %c0_i32 = arith.constant 0 : i32
    %c0_i32_0 = arith.constant 0 : i32
    %c0_i32_1 = arith.constant 0 : i32
    return %c0_i32, %c0_i32_0 : i32, i32
  }
  func.func @transform_4(%arg0: i32) -> (i32, i32) {
    %c0_i32 = arith.constant 0 : i32
    %c0_i32_0 = arith.constant 0 : i32
    %c0_i32_1 = arith.constant 0 : i32
    return %c0_i32, %c0_i32_0 : i32, i32
  }
  func.func @transform_5(%arg0: i32) -> (i32, i32) {
    %c0_i32 = arith.constant 0 : i32
    %c0_i32_0 = arith.constant 0 : i32
    %c0_i32_1 = arith.constant 0 : i32
    return %c0_i32, %c0_i32_0 : i32, i32
  }
  func.func @transform_6(%arg0: i32) -> (i32, i32, i32) {
    %c0_i32 = arith.constant 0 : i32
    %c0_i32_0 = arith.constant 0 : i32
    %c0_i32_1 = arith.constant 0 : i32
    return %arg0, %c0_i32, %c0_i32_0 : i32, i32, i32
  }
}

</mosaic_0001>

<bundles_post_ra>
// kernel: tpu_custom_call.1
= control target key start
LH: loop header
LB: loop body
LE: loop exit
PB: predicated region body
PF: predicated region fallthrough
CT: control target
= control target key end

     0   :  { %s1236_s0 = inlined_call_operand.hbm [shape: f32[2,8,256], index: 0, kind: input, shape index: {}]   ;;  %s1237_s1 = inlined_call_operand.vmem [shape: f32[8,8], index: 1, kind: input, shape index: {}]   ;;  %s1238_s2 = inlined_call_operand.vmem [shape: f32[8,1], index: 2, kind: input, shape index: {}]   ;;  %s1239_s3 = inlined_call_operand.hbm [shape: f32[256,128], index: 3, kind: input, shape index: {}]   ;;  %s1240_s4 = inlined_call_operand.vmem [shape: f32[8,128], index: 4, kind: input, shape index: {}]   ;;  %s1241_s5 = inlined_call_operand.hbm [shape: f32[128,256], index: 5, kind: input, shape index: {}]   ;;  %s1242_s6 = inlined_call_operand.hbm [shape: f32[2,16,256], index: 6, kind: output, shape index: {}]  }
   0x1   :  { %1247 = sst [smem:[#allocation12_spill]] %s1239_s3 }
   0x2   :  { %11 = vsyncpa [#allocation3], 0 }
   0x3   :  { %13 = vsyncpa [#allocation3 + $0x1], 0 }
   0x4   :  { %14 = vsyncpa [#allocation6], 0 }
   0x5   :  { %15 = vsyncpa [#allocation4], 0 }
   0x6   :  { %17 = vsyncpa [#allocation4 + $0x1], 0  ;;  %s1036_s21 = smov 0   ;;  %s1038_s22 = smov 0  }
   0x7   :  { %s1040_s23 = smov 0   ;;  %s1042_s24 = smov 0  }
   0x8 LB: > { %s1057_s25 = sadd.s32 4294967295, %s986_s24   ;;  %s698_s26 = sadd.s32 4294967294, %s986_s24   ;;  %s986_s24 = sphi %s1042_s24, %s1266_s24   ;;  %s982_s23 = sphi %s1040_s23, %s1265_s23   ;;  %s978_s22 = sphi %s1038_s22, %s1264_s22   ;;  %s974_s21 = sphi %s1036_s21, %s1263_s21  }
   0x9   : > { %p43_p0 = scmp.ne.s32.totalorder %s978_s22, %s974_s21  ;;  %p1243_p1 = scmp.eq.s32.totalorder %s1057_s25, 0 }
   0xa   : > { %p178_p3 = scmp.eq.s32.totalorder %s698_s26, 1  ;;  %p699_p5 = scmp.ge.s32.totalorder %s986_s24, 1 }
   0xb   : > { %p1066_p4 = por %p1243_p1, %p43_p0  ;;  %p185_p7 = scmp.lt.s32.totalorder %s986_s24, 3 }
   0xc   : > { %p1071_p6 = por %p178_p3, %p43_p0  ;;  %s988_s30 = smov [#allocation5]  }
   0xd   : > { %s1248_s27 = scalar_select %p1066_p4, 1, 0 }
   0xe   : > { %s1249_s28 = scalar_select %p1071_p6, 1, 0 }
   0xf   : > { %p1076_p8 = pnand %p699_p5, %p185_p7  ;;  %s203_s7 = sshll.u32 %s988_s30, 4  ;;  %s204_s7 = int_to_ptr.vmem [resolvable:$true] %s203_s7 }
  0x10   : > { %s989_s9 = smov [#allocation7]   ;;  %s849_s11 = scalar_lea.vmem %s204_s7, 4096 }
  0x11   : > { %s1250_s29 = scalar_select %p1076_p8, 1, 0 }
  0x12   : > { %p773_p9 = pneg %p1076_p8  ;;  %s219_s10 = sshll.u32 %s989_s9, 4  ;;  %s220_s10 = int_to_ptr.vmem [resolvable:$true] %s219_s10 }
  0x13   : > { %p850_p13 = scmp.ne.s32.totalorder %s204_s7, %s849_s11  ;;  %p857_p5 = scmp.lt.s32.totalorder %s204_s7, %s204_s7 }
  0x14   : > { %p1085_p11 = pnand %p773_p9, %p1243_p1  ;;  %p858_p7 = scmp.lt.s32.totalorder %s849_s11, %s849_s11 }
  0x16   : > { %p840_p12 = pneg %p1085_p11  ;;  %p859_p10 = por %p858_p7, %p857_p5 }
  0x18   : > { %p852_p0 = pnand %p850_p13, %p840_p12 }
  0x1a   : > { %p853_p3 = pneg %p852_p0 }
  0x1c   : > { %p860_p9 = pnand %p859_p10, %p853_p3 }
  0x1e   : > { %863 = shalt.err (!%p860_p9)
}
  0x1f   : > { %s990_s12 = smov 128   ;;  %s991_s13 = smov 8  }
  0x20   : > { %s1252_s3 = sld [smem:[#allocation12_spill]]  ;;  %s875_s16 = scalar_lea.vmem %s220_s10, 4096 }
  0x21   : > { %p876_p1 = scmp.ne.s32.totalorder %s220_s10, %s875_s16  ;;  %p883_p2 = scmp.lt.s32.totalorder %s220_s10, %s220_s10 }
  0x22   : > { %p884_p6 = scmp.lt.s32.totalorder %s875_s16, %s875_s16 }
  0x23   : > { %p878_p13 = pnand %p876_p1, %p840_p12 }
  0x24   : > { %p885_p5 = por %p884_p6, %p883_p2 }
  0x25   : > { %p879_p0 = pneg %p878_p13 }
  0x26   : > { %776 = dma.hbm_to_vmem [thread:$0]  (!%p1085_p11), %s1252_s3, 4096, %s204_s7, [#allocation6], %s990_s12, %s990_s12, %s991_s13  }
  0x27   : > { %p886_p10 = pnand %p885_p5, %p879_p0 }
  0x29   : > { %889 = shalt.err (!%p886_p10)
}
  0x2a   : > { %s992_s17 = smov 256   ;;  %s993_s18 = smov 16  }
  0x2b   : > { %779 = dma.hbm_to_vmem [thread:$0]  (!%p1085_p11), %s1241_s5, 4096, %s220_s10, [#allocation6], %s992_s17, %s992_s17, %s993_s18  }
  0x2c   : > { %s1108_s26 = sadd.s32 1, %s986_s24   ;;  %s30_s7 = sadd.s32 1, %s982_s23 }
  0x2d   : > { %s27_s30 = ssub.s32 %s986_s24, %s1108_s26  ;;  %p37_p2 = scmp.ne.s32.totalorder %s982_s23, %s978_s22 }
  0x2e   : > { %p28_p1 = scmp.eq.s32.totalorder %s27_s30, 0  ;;  %p38_p6 = scmp.eq.s32.totalorder %s986_s24, 0 }
  0x2f   : > { %p1253_p3 = scmp.eq.s32.totalorder %s1057_s25, 1  ;;  %p790_p9 = scmp.lt.s32.totalorder %s986_s24, 2 }
  0x30   : > { %s1117_s9 = scalar_select %p28_p1, %s982_s23, %s30_s7  }
  0x31   : > { %p39_p12 = por %p38_p6, %p37_p2  ;;  %p1121_p7 = por %p1253_p3, %p37_p2 }
  0x32   : > { %s233_s8 = sand.u32 1, %s982_s23   ;;  %s717_s10 = sshll.u32 %s986_s24, 8 }
  0x33   : > { %s1254_s11 = scalar_select %p1121_p7, 1, 0 }
  0x34   : > { %s703_s12 = sshll.u32 %s233_s8, 4  ;;  %s1131_s15 = scalar_lea.hbm %s1236_s0, %s717_s10 }
  0x35   : > { %s237_s16 = scalar_lea.vmem [#allocation2], %s703_s12  ;;  %p1133_p11 = pnand %p790_p9, %p39_p12 }
  0x36   : > { %s245_s17 = sshll.u32 %s237_s16, 4  ;;  %s234_s19 = scalar_lea.sflag [#allocation3], %s233_s8  ;;  %s246_s17 = int_to_ptr.vmem [resolvable:$true] %s245_s17 }
  0x37   : > { %s890_s20 = scalar_lea.hbm %s1131_s15, 256  ;;  %p892_p0 = pneg %p1133_p11 }
  0x38   : > { %p891_p13 = scmp.ne.s32.totalorder %s1131_s15, %s890_s20  ;;  %s895_s10 = scalar_lea.hbm %s1236_s0, 512 }
  0x39   : > { %p896_p1 = scmp.lt.s32.totalorder %s1131_s15, %s1236_s0  ;;  %p897_p2 = scmp.lt.s32.totalorder %s895_s10, %s890_s20 }
  0x3a   : > { %p893_p5 = pnand %p892_p0, %p891_p13 }
  0x3b   : > { %p898_p6 = por %p897_p2, %p896_p1 }
  0x3c   : > { %p894_p10 = pneg %p893_p5 }
  0x3e   : > { %p899_p12 = pnand %p898_p6, %p894_p10 }
  0x40   : > { %902 = shalt.err (!%p899_p12)
}
  0x41   : > { %s903_s14 = scalar_lea.vmem %s246_s17, 256  ;;  %s994_s8 = smov [#allocation2]  }
  0x42   : > { %p904_p3 = scmp.ne.s32.totalorder %s246_s17, %s903_s14  ;;  %s908_s16 = sshll.u32 %s994_s8, 4  ;;  %s909_s16 = int_to_ptr.vmem [resolvable:$false] %s908_s16 }
  0x43   : > { %s910_s3 = scalar_lea.vmem %s909_s16, 512  ;;  %p911_p13 = scmp.lt.s32.totalorder %s246_s17, %s909_s16 }
  0x44   : > { %p906_p9 = pnand %p904_p3, %p892_p0  ;;  %p912_p5 = scmp.lt.s32.totalorder %s910_s3, %s903_s14 }
  0x46   : > { %p907_p7 = pneg %p906_p9  ;;  %p913_p4 = por %p912_p5, %p911_p13 }
  0x48   : > { %p914_p8 = pnand %p913_p4, %p907_p7 }
  0x4a   : > { %917 = shalt.err (!%p914_p8)
}
  0x4b   : > { %783 = dma.hbm_to_vmem [thread:$0]  (!%p1133_p11), %s1131_s15, 256, %s246_s17, %s234_s19  }
  0x4c   : > { %p1256_p10 = scmp.ne.s32.totalorder %s1250_s29, 0 }
  0x4d   : > { %s1154_s20 = sand.u32 (!%p1256_p10), 1, %s978_s22   ;;  %p1257_p0 = scmp.ne.s32.totalorder (!%p1256_p10), %s1248_s27, 0 }
  0x4e   : > { %254 = sbr.rel (%p1256_p10) target bundleno = 726 (0x2d6), region = 44  ;;  %s707_s30 = sshll.u32 (!%p1256_p10), %s1154_s20, 4 }
  0x4f   : > { %s257_s7 = scalar_lea.sflag (!%p1256_p10), [#allocation3], %s1154_s20  ;;  %s1158_s10 = scalar_lea.vmem (!%p1256_p10), [#allocation2], %s707_s30 }
  0x53   : > { %961 = dma.done.wait (%p1257_p0), %s257_s7, 256  }
  0x54   : > { %963 = vsyncadd (%p1257_p0), %s257_s7, 4294967040  ;;  %p1258_p4 = scmp.eq.s32.totalorder %s1057_s25, 0 }
  0x56   : > { %965 = dma.done.wait (%p1258_p4), [#allocation6], 8192   ;;  %p1259_p8 = pmov %p1258_p4 }
  0x57   : > { %v332_v0 = vld [vmem:[#allocation5 + $0xf8] sm:$0xff]  ;;  %v331_v2 = vld [vmem:[#allocation5 + $0xf0] sm:$0xff]  ;;  %v330_v4 = vld [vmem:[#allocation5 + $0xe8] sm:$0xff]  ;;  %s710_s3 = sshll.u32 %s1154_s20, 5  ;;  %v995_v34 = vmov 0.0   ;;  %vm996_vm0 = vmmov 0  }
  0x58   : > { %967 = vsyncadd (%p1259_p8), [#allocation6], 4294959104  ;;  %v316_v1 = vld [vmem:[#allocation5 + $0x78] sm:$0xff]  ;;  %719 = vmatprep.subr.mxu0 %v332_v0  ;;  %v315_v3 = vld [vmem:[#allocation5 + $0x70] sm:$0xff]  ;;  %s1170_s27 = scalar_lea.vmem [#allocation8], %s710_s3  ;;  %756 = vmatprep.subr.mxu1 %v995_v34  ;;  %v997_v36 = vmov 0  }
  0x59   : > { %720 = vmatpush3.msra.mxu0 %v316_v1  ;;  %v314_v5 = vld [vmem:[#allocation5 + $0x68] sm:$0xff]  ;;  %v329_v6 = vld [vmem:[#allocation5 + $0xe0] sm:$0xff]  ;;  %v328_v8 = vld [vmem:[#allocation5 + $0xd8] sm:$0xff]  ;;  %758 = vmatprep.mubr.msk.f32.mxu1 %vm996_vm0, %v995_v34  ;;  %vm410_vm1 = vcmask 64512   ;;  %s606_s12 = sshll.u32 %s1170_s27, 4  ;;  %s718_s14 = sshll.u32 %s1057_s25, 9  ;;  %s1186_s12 = int_to_ptr.vmem [resolvable:$true] %s606_s12 }
  0x5a   : > { %721 = vmatprep.subr.mxu0 %v331_v2  ;;  %v313_v7 = vld [vmem:[#allocation5 + $0x60] sm:$0xff]  ;;  %v312_v9 = vld [vmem:[#allocation5 + $0x58] sm:$0xff]  ;;  %v327_v10 = vld [vmem:[#allocation5 + $0xd0] sm:$0xff]  ;;  %837 = vset.pattern.permute.xlu0 %v997_v36  ;;  %s1191_s30 = scalar_lea.hbm %s1242_s6, %s718_s14  ;;  %s593_s7 = scalar_lea.sflag [#allocation4], %s1154_s20 }
  0x5b   : > { %722 = vmatpush3.msra.mxu0 %v315_v3  ;;  %v311_v11 = vld [vmem:[#allocation5 + $0x50] sm:$0xff]  ;;  %v326_v12 = vld [vmem:[#allocation5 + $0xc8] sm:$0xff]  ;;  %v325_v16 = vld [vmem:[#allocation5 + $0xc0] sm:$0xff]  ;;  %p1260_p11 = scmp.ne.s32.totalorder %s1254_s11, 0  ;;  %s998_s25 = smov [#allocation8]  }
  0x5c   : > { %723 = vmatprep.subr.mxu0 %v330_v4  ;;  %v298_v13 = vld [vmem:[%s1158_s10 + $0x8] sm:$0xff]  ;;  %v297_v15 = vld [vmem:[%s1158_s10] sm:$0xff]  ;;  %s918_s10 = scalar_lea.vmem %s1186_s12, 512  ;;  %s922_s3 = sshll.u32 %s998_s25, 4  ;;  %s923_s3 = int_to_ptr.vmem [resolvable:$false] %s922_s3 }
  0x5d   : > { %724 = vmatpush3.msra.mxu0 %v314_v5  ;;  %v310_v14 = vld [vmem:[#allocation5 + $0x48] sm:$0xff]  ;;  %300 = vst [vmem:[%s1170_s27 + $0x8] sm:$0xff] %v298_v13  ;;  %397 = vmatprep.mubr.f32.mxu0 %v298_v13  ;;  %299 = vst [vmem:[%s1170_s27] sm:$0xff] %v297_v15  ;;  %v309_v17 = vld [vmem:[#allocation5 + $0x40] sm:$0xff]  ;;  %p919_p7 = scmp.ne.s32.totalorder %s1186_s12, %s918_s10  ;;  %s924_s29 = scalar_lea.vmem %s923_s3, 1024 }
  0x5e   : > { %725 = vmatprep.subr.mxu0 %v329_v6  ;;  %v324_v18 = vld [vmem:[#allocation5 + $0xb8] sm:$0xff]  ;;  %v323_v20 = vld [vmem:[#allocation5 + $0xb0] sm:$0xff]  ;;  %v322_v22 = vld [vmem:[#allocation5 + $0xa8] sm:$0xff]  ;;  %p925_p6 = scmp.lt.s32.totalorder %s1186_s12, %s923_s3  ;;  %p926_p12 = scmp.lt.s32.totalorder %s924_s29, %s918_s10 }
  0x5f   : > { %726 = vmatpush3.msra.mxu0 %v313_v7  ;;  %v308_v19 = vld [vmem:[#allocation5 + $0x38] sm:$0xff]  ;;  %v307_v21 = vld [vmem:[#allocation5 + $0x30] sm:$0xff]  ;;  %v306_v23 = vld [vmem:[#allocation5 + $0x28] sm:$0xff]  ;;  %p920_p1 = pnand %p919_p7, %p1260_p11 }
  0x60   : > { %727 = vmatprep.subr.mxu0 %v328_v8  ;;  %v321_v24 = vld [vmem:[#allocation5 + $0xa0] sm:$0xff]  ;;  %v320_v26 = vld [vmem:[#allocation5 + $0x98] sm:$0xff]  ;;  %v319_v28 = vld [vmem:[#allocation5 + $0x90] sm:$0xff]  ;;  %p927_p3 = por %p926_p12, %p925_p6 }
  0x61   : > { %728 = vmatpush3.msra.mxu0 %v312_v9  ;;  %v305_v25 = vld [vmem:[#allocation5 + $0x20] sm:$0xff]  ;;  %v304_v27 = vld [vmem:[#allocation5 + $0x18] sm:$0xff]  ;;  %v303_v29 = vld [vmem:[#allocation5 + $0x10] sm:$0xff]  ;;  %p921_p2 = pneg %p920_p1 }
  0x62   : > { %729 = vmatprep.subr.mxu0 %v327_v10  ;;  %v318_v30 = vld [vmem:[#allocation5 + $0x88] sm:$0xff]  ;;  %v317_v32 = vld [vmem:[#allocation5 + $0x80] sm:$0xff]  ;;  %v518_v41 = vld [vmem:[#allocation7 + $0xf8] sm:$0xff] }
  0x63   : > { %730 = vmatpush3.msra.mxu0 %v311_v11  ;;  %v302_v31 = vld [vmem:[#allocation5 + $0x8] sm:$0xff]  ;;  %v301_v33 = vld [vmem:[#allocation5] sm:$0xff]  ;;  %v517_v42 = vld [vmem:[#allocation7 + $0xf0] sm:$0xff]  ;;  %p928_p9 = pnand %p927_p3, %p921_p2 }
  0x64   : > { %731 = vmatprep.subr.mxu0 %v326_v12  ;;  %v404_v35 = vld [vmem:[%s1238_s2] sm:$0xff]  ;;  %v516_v43 = vld [vmem:[#allocation7 + $0xe8] sm:$0xff]  ;;  %v514_v45 = vld [vmem:[#allocation7 + $0xd8] sm:$0xff] }
  0x65   : > { %732 = vmatpush3.msra.mxu0 %v310_v14  ;;  %407 = vperm.xlu0 %837, %v404_v35   ;;  %v403_v40 = vld [vmem:[%s1237_s1] sm:$0xff]  ;;  %v513_v46 = vld [vmem:[#allocation7 + $0xd0] sm:$0xff]  ;;  %v512_v47 = vld [vmem:[#allocation7 + $0xc8] sm:$0xff] }
  0x66   : > { %733 = vmatprep.subr.mxu0 %v325_v16  ;;  %v515_v44 = vld [vmem:[#allocation7 + $0xe0] sm:$0xff]  ;;  %v510_v49 = vld [vmem:[#allocation7 + $0xb8] sm:$0xff]  ;;  %v509_v50 = vld [vmem:[#allocation7 + $0xb0] sm:$0xff] }
  0x67   : > { %734 = vmatpush3.msra.mxu0 %v309_v17  ;;  %v511_v48 = vld [vmem:[#allocation7 + $0xc0] sm:$0xff]  ;;  %v508_v51 = vld [vmem:[#allocation7 + $0xa8] sm:$0xff]  ;;  %v506_v53 = vld [vmem:[#allocation7 + $0x98] sm:$0xff] }
  0x68   : > { %735 = vmatprep.subr.mxu0 %v324_v18  ;;  %v507_v52 = vld [vmem:[#allocation7 + $0xa0] sm:$0xff]  ;;  %v505_v54 = vld [vmem:[#allocation7 + $0x90] sm:$0xff]  ;;  %v504_v55 = vld [vmem:[#allocation7 + $0x88] sm:$0xff] }
  0x69   : > { %736 = vmatpush3.msra.mxu0 %v308_v19  ;;  %v503_v56 = vld [vmem:[#allocation7 + $0x80] sm:$0xff]  ;;  %v502_v57 = vld [vmem:[#allocation7 + $0x78] sm:$0xff]  ;;  %v501_v58 = vld [vmem:[#allocation7 + $0x70] sm:$0xff] }
  0x6a   : > { %737 = vmatprep.subr.mxu0 %v323_v20  ;;  %v500_v59 = vld [vmem:[#allocation7 + $0x68] sm:$0xff]  ;;  %v499_v60 = vld [vmem:[#allocation7 + $0x60] sm:$0xff]  ;;  %v498_v61 = vld [vmem:[#allocation7 + $0x58] sm:$0xff] }
  0x6b   : > { %738 = vmatpush3.msra.mxu0 %v307_v21  ;;  %v497_v62 = vld [vmem:[#allocation7 + $0x50] sm:$0xff]  ;;  %v496_v63 = vld [vmem:[#allocation7 + $0x48] sm:$0xff]  ;;  %v495_v0 = vld [vmem:[#allocation7 + $0x40] sm:$0xff] }
  0x6c   : > { %739 = vmatprep.subr.mxu0 %v322_v22  ;;  %v494_v1 = vld [vmem:[#allocation7 + $0x38] sm:$0xff]  ;;  %v493_v2 = vld [vmem:[#allocation7 + $0x30] sm:$0xff]  ;;  %v492_v3 = vld [vmem:[#allocation7 + $0x28] sm:$0xff] }
  0x6d   : > { %740 = vmatpush3.msra.mxu0 %v306_v23  ;;  %v491_v4 = vld [vmem:[#allocation7 + $0x20] sm:$0xff]  ;;  %v490_v5 = vld [vmem:[#allocation7 + $0x18] sm:$0xff]  ;;  %v489_v6 = vld [vmem:[#allocation7 + $0x10] sm:$0xff] }
  0x6e   : > { %741 = vmatprep.subr.mxu0 %v321_v24  ;;  %v488_v7 = vld [vmem:[#allocation7 + $0x8] sm:$0xff]  ;;  %v487_v8 = vld [vmem:[#allocation7] sm:$0xff] }
  0x6f   : > { %742 = vmatpush3.msra.mxu0 %v305_v25  ;;  %v485_v12 = vld [vmem:[%s1240_s4] sm:$0xff] }
  0x70   : > { %743 = vmatprep.subr.mxu0 %v320_v26 }
  0x71   : > { %744 = vmatpush3.msra.mxu0 %v304_v27 }
  0x72   : > { %745 = vmatprep.subr.mxu0 %v319_v28 }
  0x73   : > { %746 = vmatpush3.msra.mxu0 %v303_v29 }
  0x74   : > { %747 = vmatprep.subr.mxu0 %v318_v30 }
  0x75   : > { %748 = vmatpush3.msra.mxu0 %v302_v31 }
  0x76   : > { %749 = vmatprep.subr.mxu0 %v317_v32 }
  0x77   : > { %750 = vmatpush3.msra.mxu0 %v301_v33 }
  0x78   : > { %398 = vmatmul.mubr.f32.vlgmr.msra.gmra.mxu0 %v297_v15 }
  0xe0   : > { %v408_v9 = vpop.permute.xlu0 %407 }
 0x138   : > { %v751_v37 = vpop.f32.mrf.mxu0 }
 0x13a   : > { %v752_v38 = vpop.f32.mrf.mxu0 }
 0x13b   : > { %v753_v39 = vadd.f32 %v752_v38, %v751_v37 }
 0x13d   : > { %757 = vmatpush3.msra.mxu1 %v753_v39 }
 0x13e   : > { %759 = vmatmul.mubr.msk.f32.vlgmr.msra.gmra.mxu1 %vm410_vm1, %v403_v40  ;;  %519 = vmatprep.subr.mxu1 %v518_v41 }
 0x13f   : > { %520 = vmatpush1.msra.mxu1 %v517_v42  ;;  %583 = vmatprep.mubr.f32.mxu1 %v995_v34 }
 0x140   : > { %521 = vmatprep.subr.mxu1 %v516_v43 }
 0x141   : > { %522 = vmatpush1.msra.mxu1 %v515_v44 }
 0x142   : > { %523 = vmatprep.subr.mxu1 %v514_v45 }
 0x143   : > { %524 = vmatpush1.msra.mxu1 %v513_v46 }
 0x144   : > { %525 = vmatprep.subr.mxu1 %v512_v47 }
 0x145   : > { %526 = vmatpush1.msra.mxu1 %v511_v48 }
 0x146   : > { %527 = vmatprep.subr.mxu1 %v510_v49 }
 0x147   : > { %528 = vmatpush1.msra.mxu1 %v509_v50 }
 0x148   : > { %529 = vmatprep.subr.mxu1 %v508_v51 }
 0x149   : > { %530 = vmatpush1.msra.mxu1 %v507_v52 }
 0x14a   : > { %531 = vmatprep.subr.mxu1 %v506_v53 }
 0x14b   : > { %532 = vmatpush1.msra.mxu1 %v505_v54 }
 0x14c   : > { %533 = vmatprep.subr.mxu1 %v504_v55 }
 0x14d   : > { %534 = vmatpush1.msra.mxu1 %v503_v56 }
 0x14e   : > { %535 = vmatprep.subr.mxu1 %v502_v57 }
 0x14f   : > { %536 = vmatpush1.msra.mxu1 %v501_v58 }
 0x150   : > { %537 = vmatprep.subr.mxu1 %v500_v59 }
 0x151   : > { %538 = vmatpush1.msra.mxu1 %v499_v60 }
 0x152   : > { %539 = vmatprep.subr.mxu1 %v498_v61 }
 0x153   : > { %540 = vmatpush1.msra.mxu1 %v497_v62 }
 0x154   : > { %541 = vmatprep.subr.mxu1 %v496_v63 }
 0x155   : > { %542 = vmatpush1.msra.mxu1 %v495_v0 }
 0x156   : > { %543 = vmatprep.subr.mxu1 %v494_v1 }
 0x157   : > { %544 = vmatpush1.msra.mxu1 %v493_v2 }
 0x158   : > { %545 = vmatprep.subr.mxu1 %v492_v3 }
 0x159   : > { %546 = vmatpush1.msra.mxu1 %v491_v4 }
 0x15a   : > { %547 = vmatprep.subr.mxu1 %v490_v5 }
 0x15b   : > { %548 = vmatpush1.msra.mxu1 %v489_v6 }
 0x15c   : > { %549 = vmatprep.subr.mxu1 %v488_v7 }
 0x15d   : > { %550 = vmatpush1.msra.mxu1 %v487_v8 }
 0x1fe   : > { %v480_v10 = vpop.f32.mrf.mxu1 }
 0x1ff   : > { %v481_v11 = vadd.f32 %v480_v10, %v408_v9 }
 0x200   : > { %v760_v13 = vpop.f32.mrf.mxu1 }
 0x201   : > { %v484_v14 = vmax.f32 %v481_v11, 0.0 }
 0x203   : > { %v486_v15 = vmul.f32 %v485_v12, %v484_v14 }
 0x205   : > { %584 = vmatmul.mubr.f32.vlgmr.msra.gmra.mxu1 %v486_v15 }
 0x2c5   : > { %v585_v16 = vpop.f32.mrf.mxu1 }
 0x2c6   : > { %590 = vst [vmem:[%s1170_s27 + $0x10] sm:$0xff] %v585_v16 }
 0x2c7   : > { %v587_v17 = vpop.f32.mrf.mxu1 }
 0x2c8   : > { %591 = vst [vmem:[%s1170_s27 + $0x18] sm:$0xff] %v587_v17 }
 0x2c9   : > { %931 = shalt.err (!%p928_p9)
}
 0x2ca   : > { %s932_s27 = scalar_lea.hbm %s1191_s30, 512  ;;  %s936_s18 = scalar_lea.hbm %s1242_s6, 1024 }
 0x2cb   : > { %p933_p13 = scmp.ne.s32.totalorder %s1191_s30, %s932_s27  ;;  %p937_p0 = scmp.lt.s32.totalorder %s1191_s30, %s1242_s6 }
 0x2cc   : > { %p938_p4 = scmp.lt.s32.totalorder %s936_s18, %s932_s27 }
 0x2cd   : > { %p934_p5 = pnand %p933_p13, %p1260_p11 }
 0x2ce   : > { %p939_p8 = por %p938_p4, %p937_p0 }
 0x2cf   : > { %p935_p10 = pneg %p934_p5 }
 0x2d1   : > { %p940_p7 = pnand %p939_p8, %p935_p10 }
 0x2d3   : > { %943 = shalt.err (!%p940_p7)
}
 0x2d4   : > { %s999_s14 = smov 256   ;;  %s1000_s8 = smov 16  }
 0x2d5   : > { %771 = dma.vmem_to_hbm [thread:$0]  (%p1260_p11), %s1186_s12, 512, %s1191_s30, %s593_s7, %s999_s14, %s999_s14, %s1000_s8  }
 0x2d6 PF: > { %s621_s16 = sand.u32 1, %s974_s21   ;;  %p1261_p1 = scmp.ne.s32.totalorder %s1249_s28, 0 }
 0x2d7   : > { %p1262_p2 = scmp.ge.s32.totalorder %s986_s24, 2  ;;  %s622_s10 = scalar_lea.sflag [#allocation4], %s621_s16 }
 0x2d9   : > { %p785_p6 = pnand %p1262_p2, %p1261_p1 }
 0x2db   : > { %p786_p12 = pneg %p785_p6 }
 0x2dd   : > { %969 = dma.done.wait (%p786_p12), %s622_s10, 512  }
 0x2de   : > { %971 = vsyncadd (%p786_p12), %s622_s10, 4294966784  ;;  %p20_p3 = scmp.ge.s32.totalorder %s1108_s26, 4   ;;  %s1263_s21 = smov %s978_s22 }
 0x2df   : > { %s1264_s22 = smov %s982_s23  ;;  %s1265_s23 = smov %s1117_s9 }
 0x2e0   : > { %s1266_s24 = smov %s1108_s26  ;;  %22 = sbr.rel (!%p20_p3) target bundleno = 8 (0x8), region = 97 }
 0x2e5   :  { %627 = vsyncpa [#allocation3], 1 }
 0x2e6   :  { %629 = vsyncpa [#allocation3 + $0x1], 1 }
 0x2e7   :  { %630 = vsyncpa [#allocation6], 1 }
 0x2e8   :  { %631 = vsyncpa [#allocation4], 1 }
 0x2e9   :  { %633 = vsyncpa [#allocation4 + $0x1], 1 }

</bundles_post_ra>
